<compile_context>
chip_gen: v7x
topology: tpu7x:2x2x1
jax: 0.10.0
libtpu: 0.0.40
codegen_flags: <defaults>
</compile_context>

<pallas_src>
import jax
import jax.numpy as jnp
import numpy as np
from jax.experimental import pallas as pl
from jax.experimental.pallas import tpu as pltpu

# ---------------- configuration (small, consistent with the module) ----------------
B = 2      # batch
R = 32     # attention_rnn_dim
A = 32     # attention_dim
M = 4      # num_mixtures
T = 8      # encoder max_time
E = 32     # encoder embedding dim (memory feature dim)
TM = M * T

OUT_W = 128                    # lane-dense packed output width
OUT_PAD = OUT_W - (E + T + M)  # zero padding lanes

# aux constant-pack layout: one (8,128) tile, DMA'd once per pallas_call
ROW_B1, ROW_B2, ROW_POS, ROW_KEEP = 0, 1, 2, 3
ROW_PREV = ROW_KEEP + B
AUX_ROWS = 8
assert ROW_PREV + B <= AUX_ROWS, "aux pack layout assumes small batch"

# hparams (attention_layers = 1)
NORMALIZE_ATTENTION_INPUT = True
DELTA_MIN_LIMIT = 0.0      # falsy -> clamp skipped (matches `if self.delta_min_limit:`)
DELTA_OFFSET = 0.0         # falsy -> offset skipped
LIN_BIAS = True


# ---------------------------------- Pallas kernel ----------------------------------
def gmm_attention_kernel(q_ref, w1_ref, w2_ref, mem_ref, aux_ref,
                         expand_ref, reduce_ref, out_ref, prev_ref):
    # aux tile is VMEM-resident for the whole call (constant index_map).
    aux = aux_ref[...]                                      # (8, 128)
    b1 = aux[ROW_B1:ROW_B1 + 1, 0:A]                        # (1, A)
    b2 = aux[ROW_B2:ROW_B2 + 1, 0:3 * M]                    # (1, 3M)
    pos_f = aux[ROW_POS:ROW_POS + 1, 0:TM]                  # (1, TM), pos_f[m*T+t] = t
    keep = aux[ROW_KEEP:ROW_KEEP + B, 0:T]                  # (B, T) 1=valid, 0=padded

    # previous_location carried in VMEM scratch across decode steps.
    @pl.when(pl.program_id(0) == 0)
    def _():
        prev_ref[...] = aux[ROW_PREV:ROW_PREV + B, 0:M]

    q = q_ref[0]                                            # (B, R)
    if NORMALIZE_ATTENTION_INPUT:
        q = jnp.tanh(q)

    # self.F : LinearNorm(R, A) -> tanh -> Linear(A, 3M)
    h = jnp.tanh(jnp.dot(q, w1_ref[...],
                         preferred_element_type=jnp.float32) + b1)            # (B, A)
    p = jnp.dot(h, w2_ref[...], preferred_element_type=jnp.float32)           # (B, 3M)
    if LIN_BIAS:
        p = p + b2

    # One fused EUP sigmoid push for [delta | scale].
    sig = jax.nn.sigmoid(p[:, M:3 * M])                     # (B, 2M)
    delta = sig[:, 0:M]
    if DELTA_MIN_LIMIT:
        delta = jnp.maximum(delta, DELTA_MIN_LIMIT)
    if DELTA_OFFSET:
        delta = delta + DELTA_OFFSET

    loc = prev_ref[...] + delta                             # (B, M)
    prev_ref[...] = loc                                     # carry to next step

    scale = sig[:, M:2 * M] * 2.0 + 1.0
    std = jax.nn.softplus(scale + 5.0) + 1e-5               # (B, M)
    inv_std = 1.0 / std                                     # exact (keeps tolerance)
    w_mix = jax.nn.softmax(p[:, 0:M], axis=-1) + 1e-5       # (B, M)

    # Per-mixture scalars -> flat (B, M*T) layout via tiny MXU dots against the
    # one-hot expansion matrix (MXU is idle; frees the XLU from lane broadcasts).
    expand = expand_ref[...]                                # (M, TM)
    loc_f = jnp.dot(loc, expand, preferred_element_type=jnp.float32)
    isd_f = jnp.dot(inv_std, expand, preferred_element_type=jnp.float32)
    w_f = jnp.dot(w_mix, expand, preferred_element_type=jnp.float32)

    d = (loc_f - pos_f) * isd_f                             # (loc - pos) / std
    half = 0.5 * isd_f                                      # 0.5 / std

    # Single fused tanh push over (B, 2*TM): [arg(z1) | arg(z2)]
    t_all = jnp.tanh(jnp.concatenate([d + half, d - half], axis=-1))
    z = (t_all[:, :TM] - t_all[:, TM:]) * 0.5               # (B, TM)

    # bmm(z, w) over mixtures -> alignment (B, T) via one-hot reduction on the MXU.
    align = jnp.dot(z * w_f, reduce_ref[...], preferred_element_type=jnp.float32)

    # masked_fill_(mask, 0) via float multiply, then softmax over T (faithful to
    # the PyTorch module, incl. pre-softmax fill-0).
    align = align * keep
    attw = jax.nn.softmax(align, axis=1)                    # (B, T)

    # bmm(attw.unsqueeze(1), memory).squeeze(1) -> (B, E): batched dot on the MXU.
    ctx = jnp.einsum('bqt,bte->bqe', attw[:, None, :], mem_ref[...],
                     preferred_element_type=jnp.float32)[:, 0, :]

    # Lane-dense packed output row: [ctx(E) | attw(T) | loc(M) | zeros(pad)],
    # written with slice stores (no lane-concat assembly).
    out_ref[0, :, 0:E] = ctx
    out_ref[0, :, E:E + T] = attw
    out_ref[0, :, E + T:E + T + M] = loc
    out_ref[0, :, E + T + M:OUT_W] = jnp.zeros((B, OUT_PAD), jnp.float32)


# ------------------------------------ wrapper ------------------------------------
def gmm_attention_fused(queries, w1, b1, w2, b2, memory, previous_location, mask):
    """Run S decode steps of GMMAttention.forward in one pallas_call.

    queries: (S, B, R); memory: (B, T, E); previous_location: (B, 1, M); mask: (B, T).
    Returns per-step (context (S,B,E), attention_weights (S,B,T), loc (S,B,M)),
    with previous_location carried step-to-step inside the kernel.
    """
    S = queries.shape[0]
    keep = (mask == 0).astype(jnp.float32)                  # padded -> 0.0
    prev0 = previous_location.reshape(B, M)

    # Pack the tiny auxiliary operands into ONE (8,128) tile (single DMA).
    aux = jnp.zeros((AUX_ROWS, 128), jnp.float32)
    aux = aux.at[ROW_B1, :A].set(b1.reshape(A))
    aux = aux.at[ROW_B2, :3 * M].set(b2.reshape(3 * M))
    aux = aux.at[ROW_POS, :TM].set(jnp.tile(jnp.arange(T, dtype=jnp.float32), (M,)))
    aux = aux.at[ROW_KEEP:ROW_KEEP + B, :T].set(keep)
    aux = aux.at[ROW_PREV:ROW_PREV + B, :M].set(prev0)

    # One-hot expansion / reduction matrices for the MXU (host-built constants).
    expand_np = np.zeros((M, TM), np.float32)
    reduce_np = np.zeros((TM, T), np.float32)
    for m in range(M):
        expand_np[m, m * T:(m + 1) * T] = 1.0
        reduce_np[m * T:(m + 1) * T, :] = np.eye(T, dtype=np.float32)
    expand = jnp.asarray(expand_np)
    reduce_mat = jnp.asarray(reduce_np)

    per_step_flops = 2 * (B * R * A + B * A * 3 * M + 3 * B * M * TM
                          + B * TM * T + B * T * E)
    per_step_trans = B * (R + A + 2 * M + 3 * M + 2 * TM + T)
    const_bytes = 4 * (R * A + A * 3 * M + B * T * E + AUX_ROWS * 128
                       + M * TM + TM * T)

    grid_spec = pltpu.PrefetchScalarGridSpec(
        num_scalar_prefetch=0,
        grid=(S,),
        in_specs=[
            pl.BlockSpec((1, B, R), lambda s: (s, 0, 0)),        # query, per step
            pl.BlockSpec((R, A), lambda s: (0, 0)),              # w1, resident
            pl.BlockSpec((A, 3 * M), lambda s: (0, 0)),          # w2, resident
            pl.BlockSpec((B, T, E), lambda s: (0, 0, 0)),        # memory, resident
            pl.BlockSpec((AUX_ROWS, 128), lambda s: (0, 0)),     # packed aux, resident
            pl.BlockSpec((M, TM), lambda s: (0, 0)),             # expansion matrix
            pl.BlockSpec((TM, T), lambda s: (0, 0)),             # reduction matrix
        ],
        out_specs=pl.BlockSpec((1, B, OUT_W), lambda s: (s, 0, 0)),
        scratch_shapes=[pltpu.VMEM((B, M), jnp.float32)],        # prevloc carry
    )

    packed = pl.pallas_call(
        gmm_attention_kernel,
        out_shape=jax.ShapeDtypeStruct((S, B, OUT_W), jnp.float32),
        grid_spec=grid_spec,
        compiler_params=pltpu.CompilerParams(
            dimension_semantics=("arbitrary",)),                 # sequential: carry
        cost_estimate=pl.CostEstimate(
            flops=S * per_step_flops,
            transcendentals=S * per_step_trans,
            bytes_accessed=S * 4 * (B * R + B * OUT_W) + const_bytes),
    )(queries, w1, w2, memory, aux, expand, reduce_mat)

    ctx = packed[:, :, :E]                                   # (S, B, E)
    attw = packed[:, :, E:E + T]                             # (S, B, T)
    loc = packed[:, :, E + T:E + T + M]                      # (S, B, M)
    return ctx, attw, loc


def gmm_attention(query, w1, b1, w2, b2, memory, previous_location, mask):
    """Single module forward (exact GMMAttention.forward semantics, S=1)."""
    ctx, attw, loc = gmm_attention_fused(query[None], w1, b1, w2, b2,
                                         memory, previous_location, mask)
    return ctx[0], attw[0], loc[0][:, None, :]


# ---------------------------- pure-JAX reference (for check) ----------------------------
def gmm_attention_ref(query, w1, b1, w2, b2, memory, previous_location, mask):
    pos = jnp.arange(T, dtype=jnp.float32).reshape(1, T, 1)
    q = jnp.tanh(query) if NORMALIZE_ATTENTION_INPUT else query
    h = jnp.tanh(q @ w1 + b1)
    p = h @ w2
    if LIN_BIAS:
        p = p + b2
    w_logits, delta, scale = p[:, :M], p[:, M:2 * M], p[:, 2 * M:]
    delta = jax.nn.sigmoid(delta)
    if DELTA_MIN_LIMIT:
        delta = jnp.maximum(delta, DELTA_MIN_LIMIT)
    if DELTA_OFFSET:
        delta = delta + DELTA_OFFSET
    loc = previous_location[:, 0, :] + delta
    scale = jax.nn.sigmoid(scale) * 2.0 + 1.0
    std = jax.nn.softplus(scale + 5.0) + 1e-5
    w_mix = jax.nn.softmax(w_logits, axis=-1) + 1e-5
    z1 = jnp.tanh((loc[:, None, :] - pos + 0.5) / std[:, None, :])
    z2 = jnp.tanh((loc[:, None, :] - pos - 0.5) / std[:, None, :])
    z = (z1 - z2) * 0.5
    align = jnp.sum(z * w_mix[:, None, :], axis=-1)
    align = jnp.where(mask != 0, 0.0, align)
    attw = jax.nn.softmax(align, axis=1)
    ctx = jnp.einsum('bt,bte->be', attw, memory)
    return ctx, attw, loc[:, None, :]


# --------------------------------------- main ---------------------------------------
if __name__ == "__main__":
    key = jax.random.PRNGKey(0)
    k_q, k_mem, k_loc, k_w1, k_b1, k_w2, k_b2 = jax.random.split(key, 7)

    S = 8  # fused decode steps in one pallas_call

    # inputs
    queries = jax.random.normal(k_q, (S, B, R), dtype=jnp.float32)
    memory = jax.random.normal(k_mem, (B, T, E), dtype=jnp.float32)
    previous_location = jax.random.uniform(k_loc, (B, 1, M), dtype=jnp.float32) * 2.0
    lengths = np.array([T, T - 2], dtype=np.int32)
    mask = jnp.asarray((np.arange(T)[None, :] >= lengths[:, None]).astype(np.int32))

    # parameters (deterministic synthetic init, mimicking the module's init scheme)
    w1 = jax.random.normal(k_w1, (R, A), dtype=jnp.float32) * (1.0 / np.sqrt(R))  # LinearNorm
    b1 = jax.random.normal(k_b1, (1, A), dtype=jnp.float32) * 0.01
    b2 = jax.random.normal(k_b2, (1, 3 * M), dtype=jnp.float32) * 0.008 - 2.0     # lin.bias*0.008 - 2
    w2 = jax.random.normal(k_w2, (A, 3 * M), dtype=jnp.float32) * 0.01            # lin.weight * 0.01

    ctx, attw, loc = gmm_attention_fused(queries, w1, b1, w2, b2, memory,
                                         previous_location, mask)
    jax.block_until_ready((ctx, attw, loc))

    # correctness check vs pure-JAX reference, stepping prevloc exactly like the
    # module's decode loop (silent on success)
    prev = previous_location
    for s in range(S):
        ctx_r, attw_r, loc_r = gmm_attention_ref(queries[s], w1, b1, w2, b2,
                                                 memory, prev, mask)
        np.testing.assert_allclose(np.asarray(ctx[s]), np.asarray(ctx_r),
                                   rtol=1e-5, atol=2e-5)
        np.testing.assert_allclose(np.asarray(attw[s]), np.asarray(attw_r),
                                   rtol=1e-5, atol=2e-5)
        np.testing.assert_allclose(np.asarray(loc[s]), np.asarray(loc_r[:, 0, :]),
                                   rtol=1e-5, atol=2e-5)
        prev = loc_r

    print("KERNEL_OK")
</pallas_src>

<mosaic_0001>
module attributes {stable_mosaic.version = 11 : i64} {
  func.func @gmm_attention_kernel(%arg0: i32, %arg1: memref<1x2x32xf32, #tpu.memory_space<vmem>>, %arg2: memref<32x32xf32, #tpu.memory_space<vmem>>, %arg3: memref<32x12xf32, #tpu.memory_space<vmem>>, %arg4: memref<2x8x32xf32, #tpu.memory_space<vmem>>, %arg5: memref<8x128xf32, #tpu.memory_space<vmem>>, %arg6: memref<4x32xf32, #tpu.memory_space<vmem>>, %arg7: memref<32x8xf32, #tpu.memory_space<vmem>>, %arg8: memref<1x2x128xf32, #tpu.memory_space<vmem>>, %arg9: memref<2x4xf32, #tpu.memory_space<vmem>>) attributes {dimension_semantics = [#tpu.dimension_semantics<arbitrary>], iteration_bounds = array<i64: 8>, scalar_prefetch = 0 : i64, scratch_operands = 1 : i64, tpu.core_type = #tpu.core_type<tc>, window_params = [{transform_indices = @transform_0, window_bounds = array<i64: 1, 2, 32>}, {pipeline_mode = #tpu.pipeline_mode<synchronous>, transform_indices = @transform_1, window_bounds = array<i64: 32, 32>}, {pipeline_mode = #tpu.pipeline_mode<synchronous>, transform_indices = @transform_2, window_bounds = array<i64: 32, 12>}, {pipeline_mode = #tpu.pipeline_mode<synchronous>, transform_indices = @transform_3, window_bounds = array<i64: 2, 8, 32>}, {pipeline_mode = #tpu.pipeline_mode<synchronous>, transform_indices = @transform_4, window_bounds = array<i64: 8, 128>}, {pipeline_mode = #tpu.pipeline_mode<synchronous>, transform_indices = @transform_5, window_bounds = array<i64: 4, 32>}, {pipeline_mode = #tpu.pipeline_mode<synchronous>, transform_indices = @transform_6, window_bounds = array<i64: 32, 8>}, {transform_indices = @transform_7, window_bounds = array<i64: 1, 2, 128>}]} {
    %c0 = arith.constant 0 : index
    %c0_0 = arith.constant 0 : index
    %0 = vector.load %arg5[%c0, %c0_0] : memref<8x128xf32, #tpu.memory_space<vmem>>, vector<8x128xf32>
    %1 = vector.extract_strided_slice %0 {offsets = [0, 0], sizes = [1, 32], strides = [1, 1]} : vector<8x128xf32> to vector<1x32xf32>
    %2 = vector.extract_strided_slice %0 {offsets = [1, 0], sizes = [1, 12], strides = [1, 1]} : vector<8x128xf32> to vector<1x12xf32>
    %3 = vector.extract_strided_slice %0 {offsets = [2, 0], sizes = [1, 32], strides = [1, 1]} : vector<8x128xf32> to vector<1x32xf32>
    %4 = vector.extract_strided_slice %0 {offsets = [3, 0], sizes = [2, 8], strides = [1, 1]} : vector<8x128xf32> to vector<2x8xf32>
    %c0_i32 = arith.constant 0 : i32
    %5 = arith.cmpi eq, %arg0, %c0_i32 : i32
    %6 = arith.extui %5 : i1 to i32
    %c0_i32_1 = arith.constant 0 : i32
    %7 = arith.cmpi ne, %6, %c0_i32_1 : i32
    scf.if %7 {
      %119 = vector.extract_strided_slice %0 {offsets = [5, 0], sizes = [2, 4], strides = [1, 1]} : vector<8x128xf32> to vector<2x4xf32>
      %c0_53 = arith.constant 0 : index
      %c0_54 = arith.constant 0 : index
      %120 = vector.load %arg9[%c0_53, %c0_54] : memref<2x4xf32, #tpu.memory_space<vmem>>, vector<2x4xf32>
      tpu.vector_store %arg9[%c0_53, %c0_54], %119 {strides = array<i32>} : memref<2x4xf32, #tpu.memory_space<vmem>>, vector<2x4xf32>,
    } else {
    }
    %c0_2 = arith.constant 0 : index
    %c0_3 = arith.constant 0 : index
    %c0_4 = arith.constant 0 : index
    %8 = vector.load %arg1[%c0_2, %c0_3, %c0_4] : memref<1x2x32xf32, #tpu.memory_space<vmem>>, vector<1x2x32xf32>
    %9 = vector.shape_cast %8 : vector<1x2x32xf32> to vector<2x32xf32>
    %10 = math.tanh %9 : vector<2x32xf32>
    %c0_5 = arith.constant 0 : index
    %c0_6 = arith.constant 0 : index
    %11 = vector.load %arg2[%c0_5, %c0_6] : memref<32x32xf32, #tpu.memory_space<vmem>>, vector<32x32xf32>
    %cst = arith.constant dense<0.000000e+00> : vector<2x32xf32>
    %12 = tpu.matmul %10, %11, %cst {dimension_numbers = #tpu.dot_dimension_numbers<[1], [0], [0], [1], [0, 0, 1, 1], [], []>} : vector<2x32xf32>, vector<32x32xf32>, vector<2x32xf32> -> vector<2x32xf32>
    %13 = vector.broadcast %1 : vector<1x32xf32> to vector<2x32xf32>
    %14 = arith.addf %12, %13 : vector<2x32xf32>
    %15 = math.tanh %14 : vector<2x32xf32>
    %c0_7 = arith.constant 0 : index
    %c0_8 = arith.constant 0 : index
    %16 = vector.load %arg3[%c0_7, %c0_8] : memref<32x12xf32, #tpu.memory_space<vmem>>, vector<32x12xf32>
    %cst_9 = arith.constant dense<0.000000e+00> : vector<2x12xf32>
    %17 = tpu.matmul %15, %16, %cst_9 {dimension_numbers = #tpu.dot_dimension_numbers<[1], [0], [0], [1], [0, 0, 1, 1], [], []>} : vector<2x32xf32>, vector<32x12xf32>, vector<2x12xf32> -> vector<2x12xf32>
    %18 = vector.broadcast %2 : vector<1x12xf32> to vector<2x12xf32>
    %19 = arith.addf %17, %18 : vector<2x12xf32>
    %20 = vector.extract_strided_slice %19 {offsets = [0, 4], sizes = [2, 8], strides = [1, 1]} : vector<2x12xf32> to vector<2x8xf32>
    %21 = arith.negf %20 : vector<2x8xf32>
    %22 = math.exp %21 : vector<2x8xf32>
    %cst_10 = arith.constant 1.000000e+00 : f32
    %23 = vector.broadcast %cst_10 : f32 to vector<2x8xf32>
    %24 = arith.addf %23, %22 : vector<2x8xf32>
    %25 = arith.divf %23, %24 : vector<2x8xf32>
    %26 = vector.extract_strided_slice %25 {offsets = [0, 0], sizes = [2, 4], strides = [1, 1]} : vector<2x8xf32> to vector<2x4xf32>
    %c0_11 = arith.constant 0 : index
    %c0_12 = arith.constant 0 : index
    %27 = vector.load %arg9[%c0_11, %c0_12] : memref<2x4xf32, #tpu.memory_space<vmem>>, vector<2x4xf32>
    %28 = arith.addf %27, %26 : vector<2x4xf32>
    %c0_13 = arith.constant 0 : index
    %c0_14 = arith.constant 0 : index
    %29 = vector.load %arg9[%c0_13, %c0_14] : memref<2x4xf32, #tpu.memory_space<vmem>>, vector<2x4xf32>
    tpu.vector_store %arg9[%c0_13, %c0_14], %28 {strides = array<i32>} : memref<2x4xf32, #tpu.memory_space<vmem>>, vector<2x4xf32>,
    %30 = vector.extract_strided_slice %25 {offsets = [0, 4], sizes = [2, 4], strides = [1, 1]} : vector<2x8xf32> to vector<2x4xf32>
    %cst_15 = arith.constant 2.000000e+00 : f32
    %31 = vector.broadcast %cst_15 : f32 to vector<2x4xf32>
    %32 = arith.mulf %30, %31 : vector<2x4xf32>
    %cst_16 = arith.constant 1.000000e+00 : f32
    %33 = vector.broadcast %cst_16 : f32 to vector<2x4xf32>
    %34 = arith.addf %32, %33 : vector<2x4xf32>
    %cst_17 = arith.constant 5.000000e+00 : f32
    %35 = vector.broadcast %cst_17 : f32 to vector<2x4xf32>
    %36 = arith.addf %34, %35 : vector<2x4xf32>
    %cst_18 = arith.constant 0.000000e+00 : f32
    %37 = vector.broadcast %cst_18 : f32 to vector<2x4xf32>
    %38 = arith.maximumf %36, %37 : vector<2x4xf32>
    %39 = vector.broadcast %cst_18 : f32 to vector<2x4xf32>
    %40 = arith.subf %36, %39 : vector<2x4xf32>
    %41 = arith.cmpf one, %40, %40 : vector<2x4xf32>
    %42 = vector.broadcast %cst_18 : f32 to vector<2x4xf32>
    %43 = arith.addf %36, %42 : vector<2x4xf32>
    %44 = math.absf %40 : vector<2x4xf32>
    %cst_19 = arith.constant 0.000000e+00 : f32
    %45 = vector.broadcast %cst_19 : f32 to vector<2x4xf32>
    %46 = arith.subf %45, %44 : vector<2x4xf32>
    %47 = math.exp %46 : vector<2x4xf32>
    %48 = math.log1p %47 : vector<2x4xf32>
    %49 = arith.addf %38, %48 : vector<2x4xf32>
    %50 = arith.select %41, %43, %49 : vector<2x4xi1>, vector<2x4xf32>
    %cst_20 = arith.constant 9.99999974E-6 : f32
    %51 = vector.broadcast %cst_20 : f32 to vector<2x4xf32>
    %52 = arith.addf %50, %51 : vector<2x4xf32>
    %cst_21 = arith.constant 1.000000e+00 : f32
    %53 = vector.broadcast %cst_21 : f32 to vector<2x4xf32>
    %54 = arith.divf %53, %52 : vector<2x4xf32>
    %55 = vector.extract_strided_slice %19 {offsets = [0, 0], sizes = [2, 4], strides = [1, 1]} : vector<2x12xf32> to vector<2x4xf32>
    %cst_22 = arith.constant dense<0xFF800000> : vector<2xf32>
    %56 = vector.multi_reduction <maximumf>, %55, %cst_22 [1] : vector<2x4xf32> to vector<2xf32>
    %cst_23 = arith.constant 0xFF800000 : f32
    %57 = vector.broadcast %cst_23 : f32 to vector<2xf32>
    %58 = arith.maximumf %57, %56 : vector<2xf32>
    %59 = vector.shape_cast %58 : vector<2xf32> to vector<2x1xf32>
    %60 = vector.broadcast %59 : vector<2x1xf32> to vector<2x4xf32>
    %61 = arith.subf %55, %60 : vector<2x4xf32>
    %62 = math.exp %61 : vector<2x4xf32>
    %cst_24 = arith.constant dense<0.000000e+00> : vector<2xf32>
    %63 = vector.multi_reduction <add>, %62, %cst_24 [1] : vector<2x4xf32> to vector<2xf32>
    %64 = vector.shape_cast %63 : vector<2xf32> to vector<2x1xf32>
    %65 = vector.broadcast %64 : vector<2x1xf32> to vector<2x4xf32>
    %66 = arith.divf %62, %65 : vector<2x4xf32>
    %cst_25 = arith.constant 9.99999974E-6 : f32
    %67 = vector.broadcast %cst_25 : f32 to vector<2x4xf32>
    %68 = arith.addf %66, %67 : vector<2x4xf32>
    %c0_26 = arith.constant 0 : index
    %c0_27 = arith.constant 0 : index
    %69 = vector.load %arg6[%c0_26, %c0_27] : memref<4x32xf32, #tpu.memory_space<vmem>>, vector<4x32xf32>
    %cst_28 = arith.constant dense<0.000000e+00> : vector<2x32xf32>
    %70 = tpu.matmul %28, %69, %cst_28 {dimension_numbers = #tpu.dot_dimension_numbers<[1], [0], [0], [1], [0, 0, 1, 1], [], []>} : vector<2x4xf32>, vector<4x32xf32>, vector<2x32xf32> -> vector<2x32xf32>
    %cst_29 = arith.constant dense<0.000000e+00> : vector<2x32xf32>
    %71 = tpu.matmul %54, %69, %cst_29 {dimension_numbers = #tpu.dot_dimension_numbers<[1], [0], [0], [1], [0, 0, 1, 1], [], []>} : vector<2x4xf32>, vector<4x32xf32>, vector<2x32xf32> -> vector<2x32xf32>
    %cst_30 = arith.constant dense<0.000000e+00> : vector<2x32xf32>
    %72 = tpu.matmul %68, %69, %cst_30 {dimension_numbers = #tpu.dot_dimension_numbers<[1], [0], [0], [1], [0, 0, 1, 1], [], []>} : vector<2x4xf32>, vector<4x32xf32>, vector<2x32xf32> -> vector<2x32xf32>
    %73 = vector.broadcast %3 : vector<1x32xf32> to vector<2x32xf32>
    %74 = arith.subf %70, %73 : vector<2x32xf32>
    %75 = arith.mulf %74, %71 : vector<2x32xf32>
    %cst_31 = arith.constant 5.000000e-01 : f32
    %76 = vector.broadcast %cst_31 : f32 to vector<2x32xf32>
    %77 = arith.mulf %76, %71 : vector<2x32xf32>
    %78 = arith.addf %75, %77 : vector<2x32xf32>
    %79 = arith.subf %75, %77 : vector<2x32xf32>
    %80 = tpu.concatenate %78, %79 in 1 : vector<2x32xf32>, vector<2x32xf32> -> vector<2x64xf32>
    %81 = math.tanh %80 : vector<2x64xf32>
    %82 = vector.extract_strided_slice %81 {offsets = [0, 0], sizes = [2, 32], strides = [1, 1]} : vector<2x64xf32> to vector<2x32xf32>
    %83 = vector.extract_strided_slice %81 {offsets = [0, 32], sizes = [2, 32], strides = [1, 1]} : vector<2x64xf32> to vector<2x32xf32>
    %84 = arith.subf %82, %83 : vector<2x32xf32>
    %cst_32 = arith.constant 5.000000e-01 : f32
    %85 = vector.broadcast %cst_32 : f32 to vector<2x32xf32>
    %86 = arith.mulf %84, %85 : vector<2x32xf32>
    %87 = arith.mulf %86, %72 : vector<2x32xf32>
    %c0_33 = arith.constant 0 : index
    %c0_34 = arith.constant 0 : index
    %88 = vector.load %arg7[%c0_33, %c0_34] : memref<32x8xf32, #tpu.memory_space<vmem>>, vector<32x8xf32>
    %cst_35 = arith.constant dense<0.000000e+00> : vector<2x8xf32>
    %89 = tpu.matmul %87, %88, %cst_35 {dimension_numbers = #tpu.dot_dimension_numbers<[1], [0], [0], [1], [0, 0, 1, 1], [], []>} : vector<2x32xf32>, vector<32x8xf32>, vector<2x8xf32> -> vector<2x8xf32>
    %90 = arith.mulf %89, %4 : vector<2x8xf32>
    %cst_36 = arith.constant dense<0xFF800000> : vector<2xf32>
    %91 = vector.multi_reduction <maximumf>, %90, %cst_36 [1] : vector<2x8xf32> to vector<2xf32>
    %cst_37 = arith.constant 0xFF800000 : f32
    %92 = vector.broadcast %cst_37 : f32 to vector<2xf32>
    %93 = arith.maximumf %92, %91 : vector<2xf32>
    %94 = vector.shape_cast %93 : vector<2xf32> to vector<2x1xf32>
    %95 = vector.broadcast %94 : vector<2x1xf32> to vector<2x8xf32>
    %96 = arith.subf %90, %95 : vector<2x8xf32>
    %97 = math.exp %96 : vector<2x8xf32>
    %cst_38 = arith.constant dense<0.000000e+00> : vector<2xf32>
    %98 = vector.multi_reduction <add>, %97, %cst_38 [1] : vector<2x8xf32> to vector<2xf32>
    %99 = vector.shape_cast %98 : vector<2xf32> to vector<2x1xf32>
    %100 = vector.broadcast %99 : vector<2x1xf32> to vector<2x8xf32>
    %101 = arith.divf %97, %100 : vector<2x8xf32>
    %102 = vector.shape_cast %101 : vector<2x8xf32> to vector<2x1x8xf32>
    %c0_39 = arith.constant 0 : index
    %c0_40 = arith.constant 0 : index
    %c0_41 = arith.constant 0 : index
    %103 = vector.load %arg4[%c0_39, %c0_40, %c0_41] : memref<2x8x32xf32, #tpu.memory_space<vmem>>, vector<2x8x32xf32>
    "tpu.trace_start"() <{level = 10 : i32, message = "bqt,bte->bqe"}> : () -> ()
    %cst_42 = arith.constant dense<0.000000e+00> : vector<2x1x32xf32>
    %104 = tpu.matmul %102, %103, %cst_42 {dimension_numbers = #tpu.dot_dimension_numbers<[2], [1], [1], [2], [0, 0, 0, 1, 1, 2], [0], [0]>} : vector<2x1x8xf32>, vector<2x8x32xf32>, vector<2x1x32xf32> -> vector<2x1x32xf32>
    "tpu.trace_stop"() : () -> ()
    %105 = vector.shape_cast %104 : vector<2x1x32xf32> to vector<2x32xf32>
    %c0_43 = arith.constant 0 : index
    %c0_44 = arith.constant 0 : index
    %c0_45 = arith.constant 0 : index
    %106 = vector.load %arg8[%c0_43, %c0_44, %c0_45] : memref<1x2x128xf32, #tpu.memory_space<vmem>>, vector<1x2x32xf32>
    %107 = vector.shape_cast %106 : vector<1x2x32xf32> to vector<2x32xf32>
    %108 = vector.shape_cast %105 : vector<2x32xf32> to vector<1x2x32xf32>
    tpu.vector_store %arg8[%c0_43, %c0_44, %c0_45], %108 {strides = array<i32>} : memref<1x2x128xf32, #tpu.memory_space<vmem>>, vector<1x2x32xf32>,
    %c0_46 = arith.constant 0 : index
    %c0_47 = arith.constant 0 : index
    %c32 = arith.constant 32 : index
    %109 = vector.load %arg8[%c0_46, %c0_47, %c32] : memref<1x2x128xf32, #tpu.memory_space<vmem>>, vector<1x2x8xf32>
    %110 = vector.shape_cast %109 : vector<1x2x8xf32> to vector<2x8xf32>
    %111 = vector.shape_cast %101 : vector<2x8xf32> to vector<1x2x8xf32>
    tpu.vector_store %arg8[%c0_46, %c0_47, %c32], %111 {strides = array<i32>} : memref<1x2x128xf32, #tpu.memory_space<vmem>>, vector<1x2x8xf32>,
    %c0_48 = arith.constant 0 : index
    %c0_49 = arith.constant 0 : index
    %c40 = arith.constant 40 : index
    %112 = vector.load %arg8[%c0_48, %c0_49, %c40] : memref<1x2x128xf32, #tpu.memory_space<vmem>>, vector<1x2x4xf32>
    %113 = vector.shape_cast %112 : vector<1x2x4xf32> to vector<2x4xf32>
    %114 = vector.shape_cast %28 : vector<2x4xf32> to vector<1x2x4xf32>
    tpu.vector_store %arg8[%c0_48, %c0_49, %c40], %114 {strides = array<i32>} : memref<1x2x128xf32, #tpu.memory_space<vmem>>, vector<1x2x4xf32>,
    %cst_50 = arith.constant 0.000000e+00 : f32
    %115 = vector.broadcast %cst_50 : f32 to vector<2x84xf32>
    %c0_51 = arith.constant 0 : index
    %c0_52 = arith.constant 0 : index
    %c44 = arith.constant 44 : index
    %116 = vector.load %arg8[%c0_51, %c0_52, %c44] : memref<1x2x128xf32, #tpu.memory_space<vmem>>, vector<1x2x84xf32>
    %117 = vector.shape_cast %116 : vector<1x2x84xf32> to vector<2x84xf32>
    %118 = vector.shape_cast %115 : vector<2x84xf32> to vector<1x2x84xf32>
    tpu.vector_store %arg8[%c0_51, %c0_52, %c44], %118 {strides = array<i32>} : memref<1x2x128xf32, #tpu.memory_space<vmem>>, vector<1x2x84xf32>,
    return
  }
  func.func @transform_0(%arg0: i32) -> (i32, i32, i32) {
    %c0_i32 = arith.constant 0 : i32
    %c0_i32_0 = arith.constant 0 : i32
    %c0_i32_1 = arith.constant 0 : i32
    return %arg0, %c0_i32, %c0_i32_0 : i32, i32, i32
  }
  func.func @transform_1(%arg0: i32) -> (i32, i32) {
    %c0_i32 = arith.constant 0 : i32
    %c0_i32_0 = arith.constant 0 : i32
    %c0_i32_1 = arith.constant 0 : i32
    return %c0_i32, %c0_i32_0 : i32, i32
  }
  func.func @transform_2(%arg0: i32) -> (i32, i32) {
    %c0_i32 = arith.constant 0 : i32
    %c0_i32_0 = arith.constant 0 : i32
    %c0_i32_1 = arith.constant 0 : i32
    return %c0_i32, %c0_i32_0 : i32, i32
  }
  func.func @transform_3(%arg0: i32) -> (i32, i32, i32) {
    %c0_i32 = arith.constant 0 : i32
    %c0_i32_0 = arith.constant 0 : i32
    %c0_i32_1 = arith.constant 0 : i32
    %c0_i32_2 = arith.constant 0 : i32
    return %c0_i32, %c0_i32_0, %c0_i32_1 : i32, i32, i32
  }
  func.func @transform_4(%arg0: i32) -> (i32, i32) {
    %c0_i32 = arith.constant 0 : i32
    %c0_i32_0 = arith.constant 0 : i32
    %c0_i32_1 = arith.constant 0 : i32
    return %c0_i32, %c0_i32_0 : i32, i32
  }
  func.func @transform_5(%arg0: i32) -> (i32, i32) {
    %c0_i32 = arith.constant 0 : i32
    %c0_i32_0 = arith.constant 0 : i32
    %c0_i32_1 = arith.constant 0 : i32
    return %c0_i32, %c0_i32_0 : i32, i32
  }
  func.func @transform_6(%arg0: i32) -> (i32, i32) {
    %c0_i32 = arith.constant 0 : i32
    %c0_i32_0 = arith.constant 0 : i32
    %c0_i32_1 = arith.constant 0 : i32
    return %c0_i32, %c0_i32_0 : i32, i32
  }
  func.func @transform_7(%arg0: i32) -> (i32, i32, i32) {
    %c0_i32 = arith.constant 0 : i32
    %c0_i32_0 = arith.constant 0 : i32
    %c0_i32_1 = arith.constant 0 : i32
    return %arg0, %c0_i32, %c0_i32_0 : i32, i32, i32
  }
}

</mosaic_0001>

<bundles_post_ra>
// kernel: tpu_custom_call.1
= control target key start
LH: loop header
LB: loop body
LE: loop exit
PB: predicated region body
PF: predicated region fallthrough
CT: control target
= control target key end

     0   :  { %12 = vsyncpa [#allocation4], 0  ;;  %s1633_s0 = inlined_call_operand.vmem [shape: f32[8,2,32], index: 0, kind: input, shape index: {}]   ;;  %s1634_s1 = inlined_call_operand.vmem [shape: f32[32,32], index: 1, kind: input, shape index: {}]   ;;  %s1635_s2 = inlined_call_operand.vmem [shape: f32[32,12], index: 2, kind: input, shape index: {}]   ;;  %s1636_s3 = inlined_call_operand.vmem [shape: f32[2,8,32], index: 3, kind: input, shape index: {}]   ;;  %s1637_s4 = inlined_call_operand.vmem [shape: f32[8,128], index: 4, kind: input, shape index: {}]   ;;  %s1638_s5 = inlined_call_operand.vmem [shape: f32[4,32], index: 5, kind: input, shape index: {}]   ;;  %s1639_s6 = inlined_call_operand.vmem [shape: f32[32,8], index: 6, kind: input, shape index: {}]   ;;  %s1640_s7 = inlined_call_operand.hbm [shape: f32[8,2,128], index: 7, kind: output, shape index: {}]  }
   0x1   :  { %14 = vsyncpa [#allocation4 + $0x1], 0  ;;  %s1412_s24 = smov 0   ;;  %s1414_s25 = smov 0  }
   0x2   :  { %s1416_s26 = smov 0   ;;  %s1418_s27 = smov 0  }
   0x3 LB: > { %s1433_s28 = sadd.s32 4294967295, %s1360_s27   ;;  %s1102_s29 = sadd.s32 4294967294, %s1360_s27   ;;  %s1360_s27 = sphi %s1418_s27, %s1646_s27   ;;  %s1356_s26 = sphi %s1416_s26, %s1645_s26   ;;  %s1352_s25 = sphi %s1414_s25, %s1644_s25   ;;  %s1348_s24 = sphi %s1412_s24, %s1643_s24  }
   0x4   : > { %s1437_s30 = sadd.s32 1, %s1360_s27   ;;  %s179_s8 = sadd.s32 1, %s1356_s26 }
   0x5   : > { %s176_s9 = ssub.s32 %s1360_s27, %s1437_s30  ;;  %p189_p0 = scmp.ne.s32.totalorder %s1356_s26, %s1352_s25 }
   0x6   : > { %p177_p1 = scmp.eq.s32.totalorder %s176_s9, 0  ;;  %p190_p2 = scmp.eq.s32.totalorder %s1433_s28, 7 }
   0x7   : > { %p195_p3 = scmp.ne.s32.totalorder %s1352_s25, %s1348_s24  ;;  %p196_p4 = scmp.eq.s32.totalorder %s1102_s29, 7 }
   0x8   : > { %s1448_s10 = scalar_select %p177_p1, %s1356_s26, %s179_s8  }
   0x9   : > { %p1450_p5 = por %p190_p2, %p189_p0  ;;  %p1454_p6 = por %p196_p4, %p195_p3 }
   0xa   : > { %p1105_p7 = scmp.ge.s32.totalorder %s1360_s27, 1  ;;  %p239_p8 = scmp.lt.s32.totalorder %s1360_s27, 9 }
   0xc   : > { %p240_p9 = pnand %p1105_p7, %p239_p8 }
   0xd   : > { %s267_s13 = sand.u32 (!%p240_p9), 1, %s1352_s25   ;;  %p270_p10 = scmp.lt.s32.totalorder (!%p240_p9), %s1433_s28, 7  ;;  %v1465_v0 = vld [vmem:[%s1637_s4] sm:$0xff] (!%p240_p9) }
   0xe   : > { %243 = sbr.rel (%p240_p9) target bundleno = 1909 (0x775), region = 48  ;;  %s1106_s16 = sshll.u32 (!%p240_p9), %s267_s13, 1 }
   0xf   : > { %s1473_s22 = scalar_lea.vmem (!%p240_p9), [#allocation3], %s1106_s16  ;;  %p1108_p11 = scmp.ne.s32.totalorder (!%p240_p9), %s1433_s28, 0 }
  0x15   : > { %s271_s17 = scalar_select %p270_p10, %s1433_s28, 7 }
  0x16   : > { %278 = sbr.rel (%p1108_p11) target bundleno = 29 (0x1d), region = 52  ;;  %vm279_vm0 = vcmask (!%p1108_p11), 30725  }
  0x17   : > { %s1107_s18 = sshll.u32 %s271_s17, 1  ;;  %280 = vst.msk [vmem:[#allocation2 - $0x5] sm:$0x60] (!%p1108_p11), %vm279_vm0, %v1465_v0 }
  0x18   : > { %s273_s21 = scalar_lea.vmem %s1633_s0, %s1107_s18 }
  0x1d PF: > { %v283_v1 = vld [vmem:[%s1634_s1] sm:$0xff]  ;;  %v284_v2 = vld [vmem:[%s1634_s1 + $0x8] sm:$0xff]  ;;  %v285_v3 = vld [vmem:[%s1634_s1 + $0x10] sm:$0xff]  ;;  %v1362_v4 = vmov 0.0|0.0   ;;  %vm1363_vm1 = vmmov 0   ;;  %v1364_v7 = vmov 0.0   ;;  %v287_v17 = vlaneseq }
  0x1e   : > { %1208 = vmatprep.subr.bf16.mxu0 %v1362_v4  ;;  %v1209_v5 = vpack.c.bf16 %v284_v2, %v283_v1  ;;  %v286_v6 = vld [vmem:[%s1634_s1 + $0x18] sm:$0xff]  ;;  %1158 = vmatprep.mubr.msk.f32.mxu0 %vm1363_vm1, %v1364_v7  ;;  %v281_v8 = vld [vmem:[%s273_s21] sm:$0x3]  ;;  %vm291_vm2 = vcmask 261120   ;;  %v367_v12 = vld [vmem:[%s1635_s2 + $0x8] sm:$0xff]  ;;  %vm459_vm3 = vcmask 25600  }
  0x1f   : > { %1274 = vtanh.f32 %v281_v8  ;;  %1214 = vmatprep.subr.bf16.mxu1 %v1362_v4  ;;  %1169 = vmatprep.mubr.msk.f32.mxu1 %vm1363_vm1, %v1364_v7  ;;  %v1212_v9 = vpack.c.bf16 %v286_v6, %v285_v3  ;;  %v366_v11 = vld [vmem:[%s1635_s2] sm:$0xff]  ;;  %v368_v13 = vld [vmem:[%s1635_s2 + $0x10] sm:$0xff]  ;;  %v369_v15 = vld [vmem:[%s1635_s2 + $0x18] sm:$0xff]  ;;  %v1514_v18 = vshrl.u32 %v287_v17, 7  ;;  %vm502_vm4 = vcmask 1043456   ;;  %s1365_s16 = smov 124  }
  0x20   : > { %1210 = vmatpush3.bf16.msra.mxu0 %v1209_v5  ;;  %v1215_v14 = vpack.c.bf16 %v367_v12, %v366_v11  ;;  %v1218_v16 = vpack.c.bf16 %v369_v15, %v368_v13  ;;  %v497_v34 = vld [vmem:[%s1638_s5] sm:$0xf]  ;;  %s1366_s17 = smov 120   ;;  %vm498_vm7 = vcmask 31744   ;;  %s1367_s23 = smov 32   ;;  %vm827_vm8 = vcmask 58368  }
  0x21   : > { %1211 = vmatprep.subr.bf16.mxu0 %v1362_v4  ;;  %v289_v19 = vsub.s32 0, %v1514_v18  ;;  %v372_v25 = vsub.s32 1, %v1514_v18  ;;  %v453_v56 = vld [vmem:[#allocation2] sm:$0x3]  ;;  %s1368_s15 = smov 96   ;;  %vm864_vm9 = vcmask 64512  }
  0x22   : > { %1216 = vmatpush3.bf16.msra.mxu1 %v1215_v14  ;;  %vm1012_vm10 = vcmask 1041409   ;;  %vm1015_vm11 = vcmask 254976   ;;  %vm1020_vm12 = vcmask 320768   ;;  %s1122_s21 = sshll.u32 %s1433_s28, 5  ;;  %vm1025_vm13 = vcmask 353600   ;;  %s1030_s28 = scalar_lea.sflag [#allocation4], %s267_s13 }
  0x23   : > { %1217 = vmatprep.subr.bf16.mxu1 %v1362_v4  ;;  %v290_v20 = vrot.slane %v1465_v0, %v289_v19  ;;  %v373_v26 = vrot.slane %v1465_v0, %v372_v25  ;;  %v749_v25 = vld [vmem:[%s1639_s6 + $0x18] sm:$0xff]  ;;  %vm1027_vm14 = vcmask 1041760   ;;  %s1586_s9 = scalar_lea.hbm %s1640_s7, %s1122_s21 }
  0x24   : > { %1213 = vmatpush3.bf16.msra.mxu0 %v1212_v9 }
  0x25   : > { %1172 = vmatprep.subr.mxu0 %v1364_v7 }
  0x26   : > { %1219 = vmatpush3.bf16.msra.mxu1 %v1218_v16 }
  0x27   : > { %1177 = vmatprep.subr.mxu1 %v1364_v7 }
  0x29   : > { %v1275_v10 = vpop.eup %1274 }
  0x2a   : > { %1159 = vmatmul.mubr.msk.f32.vlgmr.msra.gmra.mrb[0].mxu0 %vm291_vm2, %v1275_v10  ;;  %v726_v10 = vsub.s32 2, %v1514_v18 }
  0x2b   : > { %1174 = vmatprep.mubr.msk.f32.mxu0 %vm1363_vm1, %v1364_v7  ;;  %1173 = vmatpush3.msk.msra.mxu0 %vm502_vm4, %v497_v34 }
  0x2c   : > { %1182 = vmatprep.subr.mxu0 %v1364_v7  ;;  %v727_v11 = vrot.slane %v1465_v0, %v726_v10 }
  0xfd   : > { %v361_v21 = vpop.f32.mrb[0].mxu0 }
  0xfe   : > { %v362_v22 = vadd.f32 %v361_v21, %v290_v20  ;;  %v1160_v23 = vpop.f32.mrb[1].mxu0  ;;  %v746_v20 = vld [vmem:[%s1639_s6] sm:$0xff]  ;;  %v747_v21 = vld [vmem:[%s1639_s6 + $0x8] sm:$0xff] }
 0x100   : > { %1276 = vtanh.f32 %v362_v22  ;;  %v1221_v22 = vpack.c.bf16 %v747_v21, %v746_v20 }
 0x10a   : > { %v1277_v24 = vpop.eup %1276 }
 0x10b   : > { %1170 = vmatmul.mubr.msk.f32.vlgmr.msra.gmra.mrb[0].mxu1 %vm291_vm2, %v1277_v24  ;;  %v748_v24 = vld [vmem:[%s1639_s6 + $0x10] sm:$0xff] }
 0x10c   : > { %1179 = vmatprep.mubr.msk.f32.mxu1 %vm1363_vm1, %v1364_v7  ;;  %1178 = vmatpush3.msk.msra.mxu1 %vm502_vm4, %v497_v34 }
 0x10d   : > { %1220 = vmatprep.subr.bf16.mxu1 %v1362_v4 }
 0x1de   : > { %v443_v27 = vpop.f32.mrb[0].mxu1 }
 0x1df   : > { %v444_v28 = vadd.f32 %v443_v27, %v373_v26  ;;  %v1171_v29 = vpop.f32.mrb[1].mxu1 }
 0x1e1   : > { %v1111_v30 = vmul.f32 -1.442695, %v444_v28  ;;  %v485_v31 = vsel %vm459_vm3, %v444_v28, -inf }
 0x1e2   : > { %486 = vmax.xlane.f32.xlu1 %v485_v31 }
 0x1e3   : > { %1278 = vpow2.f32 %v1111_v30 }
 0x1ed   : > { %v1279_v32 = vpop.eup %1278 }
 0x1ee   : > { %v450_v33 = vadd.f32 1.0, %v1279_v32 }
 0x1f0   : > { %1280 = vrcp.f32 %v450_v33 }
 0x1fa   : > { %v1281_v35 = vpop.eup %1280 }
 0x1fb   : > { %v461_v36 = vmul.f32 2.0, %v1281_v35  ;;  %455 = vrot.lane.b32.xlu0 %v1281_v35, %s1365_s16  ;;  %s1369_s16 = smov 40  }
 0x1fd   : > { %v462_v37 = vadd.f32 1.0, %v461_v36 }
 0x1ff   : > { %v463_v38 = vadd.f32 5.0, %v462_v37 }
 0x201   : > { %v467_v39 = vand.u32 2147483647, %v463_v38  ;;  %v464_v50 = vmax.f32 %v463_v38, 0.0  ;;  %vm465_vm6 = vcmp.ne.f32.partialorder %v463_v38, %v463_v38 }
 0x203   : > { %v468_v40 = vsub.f32 0.0, %v467_v39 }
 0x205   : > { %v469_v41 = vmul.f32 1.442695, %v468_v40 }
 0x207   : > { %1282 = vpow2.f32 %v469_v41 }
 0x211   : > { %v1283_v42 = vpop.eup %1282 }
 0x212   : > { %v471_v43 = vadd.f32 1.0, %v1283_v42  ;;  %v474_v44 = vmul.f32 -0.5, %v1283_v42  ;;  %v477_v46 = vand.u32 2147483647, %v1283_v42 }
 0x214   : > { %1284 = vlog2.f32 %v471_v43  ;;  %v475_v45 = vadd.f32 1.0, %v474_v44  ;;  %vm478_vm5 = vcmp.lt.f32.partialorder %v477_v46, 0.0004427343 }
 0x216   : > { %v476_v49 = vmul.f32 %v1283_v42, %v475_v45  ;;  %v1370_v45 = vmov 1966171168  }
 0x217   : > { %v841_v46 = vunpack.c.l.s4 %v1370_v45 }
 0x21e   : > { %v1285_v47 = vpop.eup %1284 }
 0x21f   : > { %v473_v48 = vmul.f32 0.6931472, %v1285_v47  ;;  %v842_v47 = vunpack.c.0.s8 %v841_v46 }
 0x221   : > { %v479_v51 = vsel %vm478_vm5, %v476_v49, %v473_v48  ;;  %v845_v48 = vsub.s32 %v842_v47, %v1514_v18 }
 0x222   : > { %v480_v52 = vadd.f32 %v479_v51, %v464_v50 }
 0x224   : > { %v481_v53 = vsel %vm465_vm6, %v463_v38, %v480_v52 }
 0x225   : > { %v482_v54 = vadd.f32 1e-05, %v481_v53 }
 0x227   : > { %1286 = vrcp.f32 %v482_v54  ;;  %v863_v54 = vld [vmem:[%s1636_s3 + $0x8] sm:$0xff] }
 0x231   : > { %v1287_v55 = vpop.eup %1286 }
 0x232   : > { %577 = vrot.lane.b32.xlu0 %v1287_v55, %s1366_s17 }
 0x26d   : > { %v456_v57 = vpop.permute.xlu0 %455 }
 0x26e   : > { %v1531_v58 = vadd.f32 %v456_v57, %v453_v56 }
 0x26f   : > { %v487_v59 = vpop.xlane.xlu1 %486 }
 0x270   : > { %460 = vst.msk [vmem:[#allocation2] sm:$0x3] %vm459_vm3, %v1531_v58  ;;  %v488_v60 = vsub.f32 %v444_v28, %v487_v59  ;;  %1175 = vmatmul.mubr.msk.f32.vlgmr.msra.gmra.mrb[2].mxu0 %vm498_vm7, %v1531_v58  ;;  %v1224_v28 = vpack.c.bf16 %v749_v25, %v748_v24 }
 0x271   : > { %1183 = vmatpush3.msk.msra.mxu0 %vm502_vm4, %v497_v34  ;;  %1184 = vmatprep.mubr.msk.f32.mxu0 %vm1363_vm1, %v1364_v7  ;;  %v824_v34 = vrot.slane %v1465_v0, 3  ;;  %v862_v0 = vld [vmem:[%s1636_s3] sm:$0xff] }
 0x272   : > { %v489_v61 = vmul.f32 1.442695, %v488_v60  ;;  %1198 = vmatprep.subr.mxu0 %v1364_v7 }
 0x274   : > { %1288 = vpow2.f32 %v489_v61 }
 0x27e   : > { %v1289_v62 = vpop.eup %1288 }
 0x27f   : > { %v491_v63 = vsel %vm459_vm3, %v1289_v62, 0.0 }
 0x280   : > { %492 = vadd.xlane.f32.xlu1 %v491_v63 }
 0x2a4   : > { %v578_v1 = vpop.permute.xlu0 %577 }
 0x2a5   : > { %1180 = vmatmul.mubr.msk.f32.vlgmr.msra.gmra.mrb[2].mxu1 %vm498_vm7, %v578_v1 }
 0x2a6   : > { %1195 = vmatprep.mubr.msk.f32.mxu1 %vm1363_vm1, %v1364_v7  ;;  %1222 = vmatpush3.bf16.msra.mxu1 %v1221_v22 }
 0x2a7   : > { %1223 = vmatprep.subr.bf16.mxu1 %v1362_v4 }
 0x2aa   : > { %1225 = vmatpush3.bf16.msra.mxu1 %v1224_v28 }
 0x30d   : > { %v493_v2 = vpop.xlane.xlu1 %492 }
 0x30e   : > { %1290 = vrcp.f32 %v493_v2 }
 0x318   : > { %v1291_v3 = vpop.eup %1290 }
 0x319   : > { %v495_v5 = vmul.f32 %v1291_v3, %v1289_v62 }
 0x31b   : > { %v496_v6 = vadd.f32 1e-05, %v495_v5 }
 0x31d   : > { %1185 = vmatmul.mubr.msk.f32.vlgmr.msra.gmra.mrb[4].mxu0 %vm498_vm7, %v496_v6 }
 0x31e   : > { %1200 = vmatprep.mubr.msk.f32.mxu0 %vm1363_vm1, %v1364_v7  ;;  %1199 = vmatpush3.msra.mxu0 %v862_v0 }
 0x31f   : > { %1203 = vmatprep.subr.mxu0 %v1364_v7 }
 0x343   : > { %v572_v8 = vpop.f32.mrb[2].mxu0 }
 0x344   : > { %v1176_v9 = vpop.f32.mrb[3].mxu0  ;;  %v728_v12 = vsub.f32 %v572_v8, %v727_v11 }
 0x378   : > { %v647_v13 = vpop.f32.mrb[2].mxu1 }
 0x379   : > { %v729_v14 = vmul.f32 %v728_v12, %v647_v13  ;;  %v730_v15 = vmul.f32 0.5, %v647_v13  ;;  %v1181_v16 = vpop.f32.mrb[3].mxu1 }
 0x37b   : > { %v731_v17 = vadd.f32 %v730_v15, %v729_v14  ;;  %v732_v19 = vsub.f32 %v729_v14, %v730_v15 }
 0x37d   : > { %734 = vrot.lane.b32.xlu0 %v732_v19, %s1367_s23 }
 0x3ef   : > { %v735_v23 = vpop.permute.xlu0 %734 }
 0x3f0   : > { %v737_v26 = vsel %vm291_vm2, %v731_v17, %v735_v23  ;;  %v720_v27 = vpop.f32.mrb[4].mxu0 }
 0x3f1   : > { %1292 = vtanh.f32 %v737_v26  ;;  %v1186_v29 = vpop.f32.mrb[5].mxu0 }
 0x3fb   : > { %v1293_v30 = vpop.eup %1292 }
 0x3fc   : > { %740 = vrot.lane.b32.xlu1 %v1293_v30, %s1368_s15  ;;  %s1371_s15 = smov [#allocation3]  }
 0x46e   : > { %v741_v4 = vpop.permute.xlu1 %740 }
 0x46f   : > { %v743_v31 = vsub.f32 %v1293_v30, %v741_v4 }
 0x471   : > { %v744_v32 = vmul.f32 0.5, %v743_v31 }
 0x473   : > { %v745_v33 = vmul.f32 %v744_v32, %v720_v27 }
 0x475   : > { %1196 = vmatmul.mubr.msk.f32.vlgmr.msra.gmra.mrb[4].mxu1 %vm291_vm2, %v745_v33 }
 0x548   : > { %v819_v35 = vpop.f32.mrb[4].mxu1 }
 0x549   : > { %v826_v36 = vmul.f32 %v824_v34, %v819_v35  ;;  %v1197_v37 = vpop.f32.mrb[5].mxu1 }
 0x54b   : > { %v828_v38 = vsel %vm827_vm8, %v826_v36, -inf }
 0x54c   : > { %829 = vmax.xlane.f32.xlu0 %v828_v38 }
 0x5d9   : > { %v830_v39 = vpop.xlane.xlu0 %829 }
 0x5da   : > { %v831_v40 = vsub.f32 %v826_v36, %v830_v39 }
 0x5dc   : > { %v832_v41 = vmul.f32 1.442695, %v831_v40 }
 0x5de   : > { %1294 = vpow2.f32 %v832_v41 }
 0x5e8   : > { %v1295_v42 = vpop.eup %1294 }
 0x5e9   : > { %v834_v43 = vsel %vm827_vm8, %v1295_v42, 0.0 }
 0x5ea   : > { %835 = vadd.xlane.f32.xlu1 %v834_v43 }
 0x5fb   : > { %1022 = vrot.lane.b32.xlu1 %v1531_v58, %s1369_s16  ;;  %s1302_s16 = sshll.u32 %s1371_s15, 4  ;;  %s1303_s16 = int_to_ptr.vmem [resolvable:$false] %s1302_s16 }
 0x5fc   : > { %s1304_s17 = scalar_lea.vmem %s1303_s16, 64 }
 0x677   : > { %v836_v44 = vpop.xlane.xlu1 %835 }
 0x678   : > { %1296 = vrcp.f32 %v836_v44 }
 0x67b   : > { %v1023_v62 = vpop.permute.xlu1 %1022 }
 0x682   : > { %v1297_v49 = vpop.eup %1296 }
 0x683   : > { %v838_v50 = vmul.f32 %v1297_v49, %v1295_v42 }
 0x685   : > { %1017 = vrot.lane.b32.xlu0 %v838_v50, %s1367_s23  ;;  %v846_v51 = vrot.slane %v838_v50, %v845_v48  ;;  %s1043_s23 = sshll.u32 %s1473_s22, 4  ;;  %s1588_s23 = int_to_ptr.vmem [resolvable:$true] %s1043_s23 }
 0x686   : > { %s1298_s14 = scalar_lea.vmem %s1588_s23, 32  ;;  %p1305_p1 = scmp.lt.s32.totalorder %s1588_s23, %s1303_s16 }
 0x687   : > { %v847_v52 = vcombine.high %v846_v51, %v846_v51  ;;  %v854_v53 = vrot.slane %v846_v51, %v845_v48  ;;  %p1299_p12 = scmp.ne.s32.totalorder %s1588_s23, %s1298_s14  ;;  %p1306_p2 = scmp.lt.s32.totalorder %s1304_s17, %s1298_s14 }
 0x689   : > { %1201 = vmatmul.mubr.msk.f32.vlgmr.msra.gmra.mrb[6].mxu0 %vm864_vm9, %v854_v53  ;;  %v861_v18 = vrot.slane %v847_v52, %v845_v48  ;;  %p1300_p13 = pnand %p1299_p12, %p1450_p5  ;;  %p1307_p3 = por %p1306_p2, %p1305_p1 }
 0x68a   : > { %1204 = vmatpush3.msra.mxu0 %v863_v54  ;;  %1205 = vmatprep.mubr.msk.f32.mxu0 %vm1363_vm1, %v1364_v7 }
 0x68b   : > { %p1301_p0 = pneg %p1300_p13 }
 0x68d   : > { %1206 = vmatmul.mubr.msk.f32.vlgmr.msra.gmra.mrb[8].mxu0 %vm864_vm9, %v861_v18  ;;  %p1308_p4 = pnand %p1307_p3, %p1301_p0 }
 0x6f7   : > { %v1018_v61 = vpop.permute.xlu0 %1017 }
 0x75c   : > { %v933_v55 = vpop.f32.mrb[6].mxu0 }
 0x75d   : > { %v1202_v56 = vpop.f32.mrb[7].mxu0 }
 0x760   : > { %v1005_v57 = vpop.f32.mrb[8].mxu0 }
 0x761   : > { %v1011_v58 = vrot.slane %v1005_v57, 7  ;;  %v1207_v59 = vpop.f32.mrb[9].mxu0 }
 0x763   : > { %v1013_v60 = vsel %vm1012_vm10, %v1011_v58, %v933_v55 }
 0x764   : > { %1016 = vst.msk [vmem:[%s1473_s22] sm:$0x3] %vm1015_vm11, %v1013_v60 }
 0x765   : > { %1021 = vst.msk [vmem:[%s1473_s22] sm:$0x3] %vm1020_vm12, %v1018_v61 }
 0x766   : > { %1026 = vst.msk [vmem:[%s1473_s22] sm:$0x3] %vm1025_vm13, %v1023_v62 }
 0x767   : > { %1028 = vst.msk [vmem:[%s1473_s22] sm:$0x3] %vm1027_vm14, %v1364_v7 }
 0x768   : > { %1311 = shalt.err (!%p1308_p4)
}
 0x769   : > { %s1312_s13 = scalar_lea.hbm %s1586_s9, 32  ;;  %s1316_s19 = scalar_lea.hbm %s1640_s7, 256 }
 0x76a   : > { %p1313_p7 = scmp.ne.s32.totalorder %s1586_s9, %s1312_s13  ;;  %p1317_p10 = scmp.lt.u32.totalorder %s1586_s9, %s1640_s7 }
 0x76b   : > { %p1318_p11 = scmp.lt.u32.totalorder %s1316_s19, %s1312_s13  ;;  %p1320_p13 = scmp.lt.u32.totalorder %s1312_s13, %s1586_s9 }
 0x76c   : > { %p1314_p8 = pnand %p1313_p7, %p1450_p5 }
 0x76d   : > { %p1319_p12 = por %p1318_p11, %p1317_p10 }
 0x76e   : > { %p1315_p9 = pneg %p1314_p8 }
 0x76f   : > { %p1321_p0 = por %p1320_p13, %p1319_p12 }
 0x771   : > { %p1322_p1 = pnand %p1321_p0, %p1315_p9 }
 0x773   : > { %1325 = shalt.err (!%p1322_p1)
}
 0x774   : > { %1226 = dma.vmem_to_hbm [thread:$0]  (%p1450_p5), %s1588_s23, 32, %s1586_s9, %s1030_s28  }
 0x775 PF: > { %p1232_p2 = scmp.ge.s32.totalorder %s1360_s27, 2  ;;  %s1055_s29 = sand.u32 1, %s1348_s24  }
 0x776   : > { %s1056_s8 = scalar_lea.sflag [#allocation4], %s1055_s29 }
 0x777   : > { %p1229_p3 = pnand %p1232_p2, %p1454_p6 }
 0x779   : > { %1343 = dma.done.wait (!%p1229_p3), %s1056_s8, 32  }
 0x77a   : > { %1345 = vsyncadd (!%p1229_p3), %s1056_s8, 4294967264  ;;  %p17_p4 = scmp.ge.s32.totalorder %s1437_s30, 10   ;;  %s1643_s24 = smov %s1352_s25 }
 0x77b   : > { %s1644_s25 = smov %s1356_s26  ;;  %s1645_s26 = smov %s1448_s10 }
 0x77c   : > { %s1646_s27 = smov %s1437_s30  ;;  %19 = sbr.rel (!%p17_p4) target bundleno = 3 (0x3), region = 87 }
 0x783   :  { %1061 = vsyncpa [#allocation4], 1 }
 0x784   :  { %1063 = vsyncpa [#allocation4 + $0x1], 1 }

</bundles_post_ra>
